<compile_context>
chip_gen: v7x
topology: tpu7x:2x2x1
jax: 0.10.0
libtpu: 0.0.40
codegen_flags: <defaults>
</compile_context>

<pallas_src>
import math

import jax
import jax.numpy as jnp
from jax import lax
from jax.experimental import pallas as pl
from jax.experimental.pallas import tpu as pltpu


def _round_up(x, m):
    return ((x + m - 1) // m) * m


# ----------------------------------------------------------------------------
# Pallas kernel: pre-GEMM for all input projections + masked GRU recurrence.
# PyTorch GRU cell math (gate order r, z, n):
#   r  = sigmoid(x W_ir + b_ir + h W_hr + b_hr)
#   z  = sigmoid(x W_iz + b_iz + h W_hz + b_hz)
#   n  = tanh   (x W_in + b_in + r * (h W_hn + b_hn))
#   h' = (1 - z) * n + z * h
# pack_padded_sequence semantics: h frozen once t >= context_lens[b].
# ----------------------------------------------------------------------------
def _gru_fused_kernel(maxlen_ref,          # SMEM (1,) int32 (scalar prefetch)
                      x_ref,               # (T*Bp, Dp)  f32  (time-major rows)
                      lens_ref,            # (Bp, 1)     int32
                      wi_ref,              # (Dp, 3*Hp)  packed [W_ir|W_iz|W_in]
                      wh_ref,              # (Hp, 3*Hp)  packed [W_hr|W_hz|W_hn]
                      bi_ref,              # (1, 3*Hp)   packed [b_ir|b_iz|b_in]
                      bh_ref,              # (1, 3*Hp)   packed [b_hr|b_hz|b_hn]
                      out_ref,             # (Bp, Hp)    hidden state / output
                      gates_ref):          # VMEM scratch (T*Bp, 3*Hp)
    Bp, Hp = out_ref.shape

    # --- Pre-pass: all T timesteps' input projections as one large MXU GEMM.
    gates_ref[...] = (
        jnp.dot(x_ref[...], wi_ref[...], preferred_element_type=jnp.float32)
        + bi_ref[...])

    # h_0 = 0, accumulated in-place in the (VMEM-resident) output block.
    out_ref[...] = jnp.zeros_like(out_ref)

    t_max = maxlen_ref[0]   # = max(context_lens): skip dead tail timesteps

    @pl.loop(0, t_max)
    def _(t):
        h = out_ref[...]                                   # (Bp, Hp)
        row = pl.multiple_of(t * Bp, Bp)
        gi = gates_ref[pl.ds(row, Bp), :]                  # (Bp, 3Hp) precomputed
        gh = (jnp.dot(h, wh_ref[...], preferred_element_type=jnp.float32)
              + bh_ref[...])                               # (Bp, 3Hp) recurrent
        r = jax.nn.sigmoid(gi[:, 0:Hp] + gh[:, 0:Hp])
        z = jax.nn.sigmoid(gi[:, Hp:2 * Hp] + gh[:, Hp:2 * Hp])
        n = jnp.tanh(gi[:, 2 * Hp:3 * Hp] + r * gh[:, 2 * Hp:3 * Hp])
        h_new = (1.0 - z) * n + z * h
        # freeze h for sequences that have already ended (pack_padded semantics)
        out_ref[...] = jnp.where(lens_ref[...] > t, h_new, h)


def context_gru_pallas(x_tbd, context_lens, params):
    """x_tbd: (T, B, D_in) float32 TIME-MAJOR; context_lens: (B,) -> (B, H)."""
    T, B, D = x_tbd.shape
    H = params["hidden_size"]
    Hp, Dp = params["h_pad"], params["d_pad"]
    Bp = _round_up(max(B, 1), 8)

    # Pad to lane/sublane-dense tiles (B -> x8, D/H -> x128); zeros are inert
    # for the GRU math (padded lanes/rows of the weights are zero as well).
    x_pad = jnp.zeros((T, Bp, Dp), jnp.float32)
    x_pad = x_pad.at[:, :B, :D].set(x_tbd.astype(jnp.float32))
    x2d = x_pad.reshape(T * Bp, Dp)       # rows [t*Bp, (t+1)*Bp) == timestep t

    lens_pad = jnp.zeros((Bp, 1), jnp.int32)
    lens_pad = lens_pad.at[:B, 0].set(context_lens.astype(jnp.int32))
    max_len = jnp.max(context_lens).astype(jnp.int32).reshape(1)

    grid_spec = pltpu.PrefetchScalarGridSpec(
        num_scalar_prefetch=1,
        grid=(1,),
        in_specs=[
            pl.BlockSpec((T * Bp, Dp), lambda i, ml: (0, 0)),     # x (all T)
            pl.BlockSpec((Bp, 1), lambda i, ml: (0, 0)),          # lens
            pl.BlockSpec((Dp, 3 * Hp), lambda i, ml: (0, 0)),     # W_i packed
            pl.BlockSpec((Hp, 3 * Hp), lambda i, ml: (0, 0)),     # W_h packed
            pl.BlockSpec((1, 3 * Hp), lambda i, ml: (0, 0)),      # b_i packed
            pl.BlockSpec((1, 3 * Hp), lambda i, ml: (0, 0)),      # b_h packed
        ],
        out_specs=pl.BlockSpec((Bp, Hp), lambda i, ml: (0, 0)),
        scratch_shapes=[pltpu.VMEM((T * Bp, 3 * Hp), jnp.float32)],
    )

    out = pl.pallas_call(
        _gru_fused_kernel,
        out_shape=jax.ShapeDtypeStruct((Bp, Hp), jnp.float32),
        grid_spec=grid_spec,
        compiler_params=pltpu.CompilerParams(
            dimension_semantics=("arbitrary",),
            vmem_limit_bytes=32 * 1024 * 1024),
    )(max_len, x2d, lens_pad,
      params["w_i"], params["w_h"], params["b_i"], params["b_h"])

    return out[:B, :H]


# ----------------------------------------------------------------------------
# Parameter init (mimics nn.GRU defaults + orthogonal_ on weight matrices),
# packed & zero-padded into MXU-friendly layouts:
#   w_i: (D_pad, 3*H_pad), w_h: (H_pad, 3*H_pad), b_i/b_h: (1, 3*H_pad)
# Gate g occupies columns [g*H_pad, g*H_pad + H); padding columns/rows are 0.
# ----------------------------------------------------------------------------
def _orthogonal(key, rows, cols):
    a = jax.random.normal(key, (rows, cols), dtype=jnp.float32)
    q, r = jnp.linalg.qr(a)
    q = q * jnp.sign(jnp.diagonal(r))[None, :]
    return q[:rows, :cols]


def init_gru_params(key, input_size, hidden_size):
    H, D = hidden_size, input_size
    Hp, Dp = _round_up(H, 128), _round_up(D, 128)
    k_wih, k_whh, k_bih, k_bhh = jax.random.split(key, 4)
    w_ih = _orthogonal(k_wih, 3 * H, D)          # (3H, D), PyTorch layout
    w_hh = _orthogonal(k_whh, 3 * H, H)          # (3H, H)
    bound = 1.0 / math.sqrt(H)
    b_ih = jax.random.uniform(k_bih, (3 * H,), minval=-bound, maxval=bound)
    b_hh = jax.random.uniform(k_bhh, (3 * H,), minval=-bound, maxval=bound)

    w_i = jnp.zeros((Dp, 3 * Hp), jnp.float32)
    w_h = jnp.zeros((Hp, 3 * Hp), jnp.float32)
    b_i = jnp.zeros((1, 3 * Hp), jnp.float32)
    b_h = jnp.zeros((1, 3 * Hp), jnp.float32)
    for g in range(3):
        w_i = w_i.at[:D, g * Hp:g * Hp + H].set(w_ih[g * H:(g + 1) * H, :].T)
        w_h = w_h.at[:H, g * Hp:g * Hp + H].set(w_hh[g * H:(g + 1) * H, :].T)
        b_i = b_i.at[0, g * Hp:g * Hp + H].set(b_ih[g * H:(g + 1) * H])
        b_h = b_h.at[0, g * Hp:g * Hp + H].set(b_hh[g * H:(g + 1) * H])

    return {"w_i": w_i, "w_h": w_h, "b_i": b_i, "b_h": b_h,
            "hidden_size": H, "input_size": D, "h_pad": Hp, "d_pad": Dp}


# ----------------------------------------------------------------------------
# Glue: stand-in utt_encoder (embedding + masked mean) and ContextEncoder wrap.
# Activations are produced TIME-MAJOR directly (no HBM transpose of floats).
# ----------------------------------------------------------------------------
def utt_encoder_stub(emb_table, utts, utt_lens):
    """utts: (N, L) int32, utt_lens: (N,) -> (N, E) masked-mean embedding."""
    N, L = utts.shape
    emb = emb_table[utts]                                        # (N, L, E)
    pos = jnp.arange(L)[None, :]
    mask = (pos < utt_lens[:, None]).astype(jnp.float32)[..., None]
    denom = jnp.maximum(utt_lens.astype(jnp.float32), 1.0)[:, None]
    return jnp.sum(emb * mask, axis=1) / denom                   # (N, E)


def context_encoder_forward(params, emb_table, context, context_lens,
                            utt_lens, floors, noise=False):
    B, T, L = context.shape
    # Time-major layout built from the cheap int arrays (not the float encs).
    ctx_tm = jnp.transpose(context, (1, 0, 2)).reshape(T * B, L)
    ul_tm = jnp.transpose(utt_lens, (1, 0)).reshape(T * B)
    fl_tm = jnp.transpose(floors, (1, 0)).reshape(T * B)
    utt_encs = utt_encoder_stub(emb_table, ctx_tm, ul_tm)        # (T*B, E)
    floor_one_hot = jax.nn.one_hot(fl_tm, 2, dtype=jnp.float32)  # (T*B, 2)
    x_tbd = jnp.concatenate([utt_encs, floor_one_hot],
                            axis=1).reshape(T, B, -1)            # (T, B, D_in)
    # F.dropout(p=0.25, training=False) -> identity (eval mode).
    enc = context_gru_pallas(x_tbd, context_lens, params)
    # TODO(synk): noise=True branch (torch.normal gaussian) not exercised here.
    return enc


# ----------------------------------------------------------------------------
# Pure-JAX reference of the masked GRU (for a silent correctness check).
# ----------------------------------------------------------------------------
def _gate_cols(m, H, Hp):
    return m[:, 0:H], m[:, Hp:Hp + H], m[:, 2 * Hp:2 * Hp + H]


def gru_reference(params, x_btd, context_lens):
    B, T, D = x_btd.shape
    H, Hp = params["hidden_size"], params["h_pad"]
    wir, wiz, win = _gate_cols(params["w_i"][:D], H, Hp)
    whr, whz, whn = _gate_cols(params["w_h"][:H], H, Hp)
    bir, biz, bin_ = _gate_cols(params["b_i"], H, Hp)
    bhr, bhz, bhn = _gate_cols(params["b_h"], H, Hp)

    def step(h, inp):
        x_t, t = inp
        r = jax.nn.sigmoid(x_t @ wir + bir + h @ whr + bhr)
        z = jax.nn.sigmoid(x_t @ wiz + biz + h @ whz + bhz)
        n = jnp.tanh(x_t @ win + bin_ + r * (h @ whn + bhn))
        h_new = (1.0 - z) * n + z * h
        mask = (context_lens > t)[:, None]
        return jnp.where(mask, h_new, h), None

    x_tbd = jnp.transpose(x_btd, (1, 0, 2))
    h0 = jnp.zeros((B, H), jnp.float32)
    h, _ = lax.scan(step, h0, (x_tbd, jnp.arange(T)))
    return h


if __name__ == "__main__":
    key = jax.random.PRNGKey(0)
    k_emb, k_ctx, k_ul, k_fl, k_cl, k_gru = jax.random.split(key, 6)

    # small shapes consistent with the module's forward
    B, T, L = 2, 8, 6          # batch, max_context_len, max_utt_len
    VOCAB, E, H = 50, 32, 32   # vocab, utt-enc dim, hidden_size
    INPUT_SIZE = E + 2         # utt_enc + 2-dim floor one-hot

    emb_table = 0.1 * jax.random.normal(k_emb, (VOCAB, E), dtype=jnp.float32)
    context = jax.random.randint(k_ctx, (B, T, L), 0, VOCAB, dtype=jnp.int32)
    utt_lens = jax.random.randint(k_ul, (B, T), 1, L + 1, dtype=jnp.int32)
    floors = jax.random.randint(k_fl, (B, T), 0, 2, dtype=jnp.int32)
    context_lens = jax.random.randint(k_cl, (B,), 1, T + 1, dtype=jnp.int32)

    gru_params = init_gru_params(k_gru, INPUT_SIZE, H)

    enc = context_encoder_forward(gru_params, emb_table, context,
                                  context_lens, utt_lens, floors)
    enc = jax.block_until_ready(enc)
    assert enc.shape == (B, H)

    # silent correctness check against a pure-JAX scan reference (batch-major
    # glue, mirroring the original PyTorch forward)
    utt_encs = utt_encoder_stub(emb_table, context.reshape(-1, L),
                                utt_lens.reshape(-1)).reshape(B, T, -1)
    fl1h = jax.nn.one_hot(floors.reshape(-1), 2).reshape(B, T, 2)
    x_btd = jnp.concatenate([utt_encs, fl1h], axis=2).astype(jnp.float32)
    ref = gru_reference(gru_params, x_btd, context_lens)
    assert jnp.allclose(enc, ref, atol=1e-5, rtol=1e-5)

    print("KERNEL_OK")
</pallas_src>

<mosaic_0001>
module attributes {stable_mosaic.version = 11 : i64} {
  func.func @_gru_fused_kernel(%arg0: i32, %arg1: memref<1xi32, #tpu.memory_space<smem>>, %arg2: memref<64x128xf32, #tpu.memory_space<vmem>>, %arg3: memref<8x1xi32, #tpu.memory_space<vmem>>, %arg4: memref<128x384xf32, #tpu.memory_space<vmem>>, %arg5: memref<128x384xf32, #tpu.memory_space<vmem>>, %arg6: memref<1x384xf32, #tpu.memory_space<vmem>>, %arg7: memref<1x384xf32, #tpu.memory_space<vmem>>, %arg8: memref<8x128xf32, #tpu.memory_space<vmem>>, %arg9: memref<64x384xf32, #tpu.memory_space<vmem>>) attributes {dimension_semantics = [#tpu.dimension_semantics<arbitrary>], iteration_bounds = array<i64: 1>, scalar_prefetch = 1 : i64, scratch_operands = 1 : i64, tpu.core_type = #tpu.core_type<tc>, window_params = [{pipeline_mode = #tpu.pipeline_mode<synchronous>, transform_indices = @transform_0, window_bounds = array<i64: 64, 128>}, {pipeline_mode = #tpu.pipeline_mode<synchronous>, transform_indices = @transform_1, window_bounds = array<i64: 8, 1>}, {pipeline_mode = #tpu.pipeline_mode<synchronous>, transform_indices = @transform_2, window_bounds = array<i64: 128, 384>}, {pipeline_mode = #tpu.pipeline_mode<synchronous>, transform_indices = @transform_3, window_bounds = array<i64: 128, 384>}, {pipeline_mode = #tpu.pipeline_mode<synchronous>, transform_indices = @transform_4, window_bounds = array<i64: 1, 384>}, {pipeline_mode = #tpu.pipeline_mode<synchronous>, transform_indices = @transform_5, window_bounds = array<i64: 1, 384>}, {pipeline_mode = #tpu.pipeline_mode<synchronous>, transform_indices = @transform_6, window_bounds = array<i64: 8, 128>}]} {
    %c0 = arith.constant 0 : index
    %c0_0 = arith.constant 0 : index
    %0 = vector.load %arg2[%c0, %c0_0] : memref<64x128xf32, #tpu.memory_space<vmem>>, vector<64x128xf32>
    %c0_1 = arith.constant 0 : index
    %c0_2 = arith.constant 0 : index
    %1 = vector.load %arg4[%c0_1, %c0_2] : memref<128x384xf32, #tpu.memory_space<vmem>>, vector<128x384xf32>
    %cst = arith.constant dense<0.000000e+00> : vector<64x384xf32>
    %2 = tpu.matmul %0, %1, %cst {dimension_numbers = #tpu.dot_dimension_numbers<[1], [0], [0], [1], [0, 0, 1, 1], [], []>} : vector<64x128xf32>, vector<128x384xf32>, vector<64x384xf32> -> vector<64x384xf32>
    %c0_3 = arith.constant 0 : index
    %c0_4 = arith.constant 0 : index
    %3 = vector.load %arg6[%c0_3, %c0_4] : memref<1x384xf32, #tpu.memory_space<vmem>>, vector<1x384xf32>
    %4 = vector.broadcast %3 : vector<1x384xf32> to vector<64x384xf32>
    %5 = arith.addf %2, %4 : vector<64x384xf32>
    %c0_5 = arith.constant 0 : index
    %c0_6 = arith.constant 0 : index
    %6 = vector.load %arg9[%c0_5, %c0_6] : memref<64x384xf32, #tpu.memory_space<vmem>>, vector<64x384xf32>
    tpu.vector_store %arg9[%c0_5, %c0_6], %5 {strides = array<i32>} : memref<64x384xf32, #tpu.memory_space<vmem>>, vector<64x384xf32>,
    %cst_7 = arith.constant 0.000000e+00 : f32
    %7 = vector.broadcast %cst_7 : f32 to vector<8x128xf32>
    %c0_8 = arith.constant 0 : index
    %c0_9 = arith.constant 0 : index
    %8 = vector.load %arg8[%c0_8, %c0_9] : memref<8x128xf32, #tpu.memory_space<vmem>>, vector<8x128xf32>
    tpu.vector_store %arg8[%c0_8, %c0_9], %7 {strides = array<i32>} : memref<8x128xf32, #tpu.memory_space<vmem>>, vector<8x128xf32>,
    %c0_10 = arith.constant 0 : index
    %9 = memref.load %arg1[%c0_10] : memref<1xi32, #tpu.memory_space<smem>>
    %c0_i32 = arith.constant 0 : i32
    %10 = arith.subi %9, %c0_i32 : i32
    %c1_i32 = arith.constant 1 : i32
    %c1_i32_11 = arith.constant 1 : i32
    %11 = arith.subi %c1_i32, %c1_i32_11 : i32
    %12 = arith.addi %10, %11 : i32
    %c1_i32_12 = arith.constant 1 : i32
    %13 = arith.divsi %12, %c1_i32_12 : i32
    %c1_i32_13 = arith.constant 1 : i32
    %c0_i32_14 = arith.constant 0 : i32
    %c0_i32_15 = arith.constant 0 : i32
    %14 = arith.subi %13, %c0_i32_15 : i32
    %15 = arith.addi %c0_i32_15, %14 : i32
    %c1_i32_16 = arith.constant 1 : i32
    scf.for %arg10 = %c0_i32_15 to %15 step %c1_i32_16  : i32 {
      %16 = arith.muli %arg10, %c1_i32_13 : i32
      %17 = arith.addi %c0_i32_14, %16 : i32
      %c0_17 = arith.constant 0 : index
      %c0_18 = arith.constant 0 : index
      %18 = vector.load %arg8[%c0_17, %c0_18] : memref<8x128xf32, #tpu.memory_space<vmem>>, vector<8x128xf32>
      %c8_i32 = arith.constant 8 : i32
      %19 = arith.muli %17, %c8_i32 : i32
      %20 = tpu.assume_multiple %19, 8 : i32
      %21 = arith.index_cast %20 : i32 to index
      %c0_19 = arith.constant 0 : index
      %22 = vector.load %arg9[%21, %c0_19] : memref<64x384xf32, #tpu.memory_space<vmem>>, vector<8x384xf32>
      %c0_20 = arith.constant 0 : index
      %c0_21 = arith.constant 0 : index
      %23 = vector.load %arg5[%c0_20, %c0_21] : memref<128x384xf32, #tpu.memory_space<vmem>>, vector<128x384xf32>
      %cst_22 = arith.constant dense<0.000000e+00> : vector<8x384xf32>
      %24 = tpu.matmul %18, %23, %cst_22 {dimension_numbers = #tpu.dot_dimension_numbers<[1], [0], [0], [1], [0, 0, 1, 1], [], []>} : vector<8x128xf32>, vector<128x384xf32>, vector<8x384xf32> -> vector<8x384xf32>
      %c0_23 = arith.constant 0 : index
      %c0_24 = arith.constant 0 : index
      %25 = vector.load %arg7[%c0_23, %c0_24] : memref<1x384xf32, #tpu.memory_space<vmem>>, vector<1x384xf32>
      %26 = vector.broadcast %25 : vector<1x384xf32> to vector<8x384xf32>
      %27 = arith.addf %24, %26 : vector<8x384xf32>
      %28 = vector.extract_strided_slice %22 {offsets = [0, 0], sizes = [8, 128], strides = [1, 1]} : vector<8x384xf32> to vector<8x128xf32>
      %29 = vector.extract_strided_slice %27 {offsets = [0, 0], sizes = [8, 128], strides = [1, 1]} : vector<8x384xf32> to vector<8x128xf32>
      %30 = arith.addf %28, %29 : vector<8x128xf32>
      %31 = arith.negf %30 : vector<8x128xf32>
      %32 = math.exp %31 : vector<8x128xf32>
      %cst_25 = arith.constant 1.000000e+00 : f32
      %33 = vector.broadcast %cst_25 : f32 to vector<8x128xf32>
      %34 = arith.addf %33, %32 : vector<8x128xf32>
      %35 = arith.divf %33, %34 : vector<8x128xf32>
      %36 = vector.extract_strided_slice %22 {offsets = [0, 128], sizes = [8, 128], strides = [1, 1]} : vector<8x384xf32> to vector<8x128xf32>
      %37 = vector.extract_strided_slice %27 {offsets = [0, 128], sizes = [8, 128], strides = [1, 1]} : vector<8x384xf32> to vector<8x128xf32>
      %38 = arith.addf %36, %37 : vector<8x128xf32>
      %39 = arith.negf %38 : vector<8x128xf32>
      %40 = math.exp %39 : vector<8x128xf32>
      %cst_26 = arith.constant 1.000000e+00 : f32
      %41 = vector.broadcast %cst_26 : f32 to vector<8x128xf32>
      %42 = arith.addf %41, %40 : vector<8x128xf32>
      %43 = arith.divf %41, %42 : vector<8x128xf32>
      %44 = vector.extract_strided_slice %22 {offsets = [0, 256], sizes = [8, 128], strides = [1, 1]} : vector<8x384xf32> to vector<8x128xf32>
      %45 = vector.extract_strided_slice %27 {offsets = [0, 256], sizes = [8, 128], strides = [1, 1]} : vector<8x384xf32> to vector<8x128xf32>
      %46 = arith.mulf %35, %45 : vector<8x128xf32>
      %47 = arith.addf %44, %46 : vector<8x128xf32>
      %48 = math.tanh %47 : vector<8x128xf32>
      %cst_27 = arith.constant 1.000000e+00 : f32
      %49 = vector.broadcast %cst_27 : f32 to vector<8x128xf32>
      %50 = arith.subf %49, %43 : vector<8x128xf32>
      %51 = arith.mulf %50, %48 : vector<8x128xf32>
      %52 = arith.mulf %43, %18 : vector<8x128xf32>
      %53 = arith.addf %51, %52 : vector<8x128xf32>
      %c0_28 = arith.constant 0 : index
      %c0_29 = arith.constant 0 : index
      %54 = vector.load %arg3[%c0_28, %c0_29] : memref<8x1xi32, #tpu.memory_space<vmem>>, vector<8x1xi32>
      %55 = vector.broadcast %17 : i32 to vector<8x1xi32>
      %56 = arith.cmpi sgt, %54, %55 : vector<8x1xi32>
      %57 = vector.shape_cast %56 : vector<8x1xi1> to vector<8x1xi1>
      %58 = vector.broadcast %57 : vector<8x1xi1> to vector<8x128xi1>
      %59 = arith.select %58, %53, %18 : vector<8x128xi1>, vector<8x128xf32>
      %c0_30 = arith.constant 0 : index
      %c0_31 = arith.constant 0 : index
      %60 = vector.load %arg8[%c0_30, %c0_31] : memref<8x128xf32, #tpu.memory_space<vmem>>, vector<8x128xf32>
      tpu.vector_store %arg8[%c0_30, %c0_31], %59 {strides = array<i32>} : memref<8x128xf32, #tpu.memory_space<vmem>>, vector<8x128xf32>,
    }
    return
  }
  func.func @transform_0(%arg0: i32, %arg1: memref<1xi32, #tpu.memory_space<smem>>) -> (i32, i32) {
    %c0_i32 = arith.constant 0 : i32
    %c0_i32_0 = arith.constant 0 : i32
    %c0_i32_1 = arith.constant 0 : i32
    return %c0_i32, %c0_i32_0 : i32, i32
  }
  func.func @transform_1(%arg0: i32, %arg1: memref<1xi32, #tpu.memory_space<smem>>) -> (i32, i32) {
    %c0_i32 = arith.constant 0 : i32
    %c0_i32_0 = arith.constant 0 : i32
    %c0_i32_1 = arith.constant 0 : i32
    return %c0_i32, %c0_i32_0 : i32, i32
  }
  func.func @transform_2(%arg0: i32, %arg1: memref<1xi32, #tpu.memory_space<smem>>) -> (i32, i32) {
    %c0_i32 = arith.constant 0 : i32
    %c0_i32_0 = arith.constant 0 : i32
    %c0_i32_1 = arith.constant 0 : i32
    return %c0_i32, %c0_i32_0 : i32, i32
  }
  func.func @transform_3(%arg0: i32, %arg1: memref<1xi32, #tpu.memory_space<smem>>) -> (i32, i32) {
    %c0_i32 = arith.constant 0 : i32
    %c0_i32_0 = arith.constant 0 : i32
    %c0_i32_1 = arith.constant 0 : i32
    return %c0_i32, %c0_i32_0 : i32, i32
  }
  func.func @transform_4(%arg0: i32, %arg1: memref<1xi32, #tpu.memory_space<smem>>) -> (i32, i32) {
    %c0_i32 = arith.constant 0 : i32
    %c0_i32_0 = arith.constant 0 : i32
    %c0_i32_1 = arith.constant 0 : i32
    return %c0_i32, %c0_i32_0 : i32, i32
  }
  func.func @transform_5(%arg0: i32, %arg1: memref<1xi32, #tpu.memory_space<smem>>) -> (i32, i32) {
    %c0_i32 = arith.constant 0 : i32
    %c0_i32_0 = arith.constant 0 : i32
    %c0_i32_1 = arith.constant 0 : i32
    return %c0_i32, %c0_i32_0 : i32, i32
  }
  func.func @transform_6(%arg0: i32, %arg1: memref<1xi32, #tpu.memory_space<smem>>) -> (i32, i32) {
    %c0_i32 = arith.constant 0 : i32
    %c0_i32_0 = arith.constant 0 : i32
    %c0_i32_1 = arith.constant 0 : i32
    return %c0_i32, %c0_i32_0 : i32, i32
  }
}

</mosaic_0001>

<bundles_post_ra>
// kernel: tpu_custom_call.1
= control target key start
LH: loop header
LB: loop body
LE: loop exit
PB: predicated region body
PF: predicated region fallthrough
CT: control target
= control target key end

     0   :  { %13 = vsyncpa [#allocation6], 0  ;;  %s1226_s0 = inlined_call_operand.<no memory space> [shape: s32[1], index: 0, kind: input, shape index: {}]   ;;  %s1227_s1 = inlined_call_operand.hbm [shape: f32[64,128], index: 1, kind: input, shape index: {}]   ;;  %s1228_s2 = inlined_call_operand.vmem [shape: s32[8,1], index: 2, kind: input, shape index: {}]   ;;  %s1229_s3 = inlined_call_operand.hbm [shape: f32[128,384], index: 3, kind: input, shape index: {}]   ;;  %s1230_s4 = inlined_call_operand.hbm [shape: f32[128,384], index: 4, kind: input, shape index: {}]   ;;  %s1231_s5 = inlined_call_operand.vmem [shape: f32[1,384], index: 5, kind: input, shape index: {}]   ;;  %s1232_s6 = inlined_call_operand.vmem [shape: f32[1,384], index: 6, kind: input, shape index: {}]   ;;  %s1233_s7 = inlined_call_operand.hbm [shape: f32[8,128], index: 7, kind: output, shape index: {}]  }
   0x1   :  { %14 = vsyncpa [#allocation9], 0 }
   0x2   :  { %15 = vsyncpa [#allocation7], 0  ;;  %s1040_s24 = smov [#allocation8]   ;;  %s938_s28 = scalar_lea.hbm %s1229_s3, 6144 }
   0x3   :  { %s35_s25 = sshll.u32 %s1040_s24, 4  ;;  %p939_p0 = scmp.ne.s32.totalorder %s1229_s3, %s938_s28  ;;  %s36_s25 = int_to_ptr.vmem [resolvable:$true] %s35_s25 }
   0x4   :  { %p942_p1 = scmp.lt.u32.totalorder %s938_s28, %s1229_s3 }
   0x6   :  { %p944_p2 = pnand %p942_p1, %p939_p0 }
   0x8   :  { %947 = shalt.err (!%p944_p2)
}
   0x9   :  { %s948_s10 = scalar_lea.vmem %s36_s25, 6144  ;;  %p953_p4 = scmp.lt.s32.totalorder %s36_s25, %s36_s25 }
   0xa   :  { %p949_p3 = scmp.ne.s32.totalorder %s36_s25, %s948_s10  ;;  %p954_p5 = scmp.lt.s32.totalorder %s948_s10, %s948_s10 }
   0xc   :  { %p955_p6 = por %p954_p5, %p953_p4 }
   0xe   :  { %p956_p7 = pnand %p955_p6, %p949_p3 }
  0x10   :  { %959 = shalt.err (!%p956_p7)
}
  0x11   :  { %s1041_s11 = smov 384   ;;  %s1042_s12 = smov 24  }
  0x12   :  { %41 = dma.hbm_to_vmem [thread:$0]  %s1229_s3, 6144, %s36_s25, [#allocation9], %s1041_s11, %s1041_s11, %s1042_s12  }
  0x13   :  { %s1043_s15 = smov [#allocation5]   ;;  %s960_s19 = scalar_lea.hbm %s1227_s1, 1024 }
  0x14   :  { %s21_s16 = sshll.u32 %s1043_s15, 4  ;;  %p961_p8 = scmp.ne.s32.totalorder %s1227_s1, %s960_s19  ;;  %s22_s16 = int_to_ptr.vmem [resolvable:$true] %s21_s16 }
  0x15   :  { %p964_p9 = scmp.lt.u32.totalorder %s960_s19, %s1227_s1 }
  0x17   :  { %p966_p10 = pnand %p964_p9, %p961_p8 }
  0x19   :  { %969 = shalt.err (!%p966_p10)
}
  0x1a   :  { %s970_s24 = scalar_lea.vmem %s22_s16, 1024  ;;  %p975_p12 = scmp.lt.s32.totalorder %s22_s16, %s22_s16 }
  0x1b   :  { %p971_p11 = scmp.ne.s32.totalorder %s22_s16, %s970_s24  ;;  %p976_p13 = scmp.lt.s32.totalorder %s970_s24, %s970_s24 }
  0x1d   :  { %p977_p0 = por %p976_p13, %p975_p12 }
  0x1f   :  { %p978_p1 = pnand %p977_p0, %p971_p11 }
  0x21   :  { %981 = shalt.err (!%p978_p1)
}
  0x22   :  { %s1044_s3 = smov 128   ;;  %s1045_s25 = smov 8  }
  0x23   :  { %27 = dma.hbm_to_vmem [thread:$0]  %s1227_s1, 1024, %s22_s16, [#allocation6], %s1044_s3, %s1044_s3, %s1045_s25  }
  0x24   :  { %s1046_s28 = smov [#allocation10]   ;;  %s982_s9 = scalar_lea.hbm %s1230_s4, 6144 }
  0x25   :  { %s47_s29 = sshll.u32 %s1046_s28, 4  ;;  %p983_p2 = scmp.ne.s32.totalorder %s1230_s4, %s982_s9  ;;  %s48_s29 = int_to_ptr.vmem [resolvable:$true] %s47_s29 }
  0x26   :  { %p986_p3 = scmp.lt.u32.totalorder %s982_s9, %s1230_s4 }
  0x28   :  { %p988_p4 = pnand %p986_p3, %p983_p2 }
  0x2a   :  { %991 = shalt.err (!%p988_p4)
}
  0x2b   :  { %s992_s17 = scalar_lea.vmem %s48_s29, 6144  ;;  %p997_p6 = scmp.lt.s32.totalorder %s48_s29, %s48_s29 }
  0x2c   :  { %p993_p5 = scmp.ne.s32.totalorder %s48_s29, %s992_s17  ;;  %p998_p7 = scmp.lt.s32.totalorder %s992_s17, %s992_s17 }
  0x2e   :  { %p999_p8 = por %p998_p7, %p997_p6 }
  0x30   :  { %p1000_p9 = pnand %p999_p8, %p993_p5 }
  0x32   :  { %1003 = shalt.err (!%p1000_p9)
}
  0x33   :  { %53 = dma.hbm_to_vmem [thread:$0]  %s1230_s4, 6144, %s48_s29, [#allocation9], %s1041_s11, %s1041_s11, %s1042_s12  }
  0x34   :  { %1030 = dma.done.wait [#allocation6], 1024  }
  0x35   :  { %1031 = vsyncadd [#allocation6], 4294966272 }
  0x36   :  { %1032 = dma.done.wait [#allocation9], 12288  }
  0x37   :  { %1033 = vsyncadd [#allocation9], 4294955008  ;;  %v1047_v0 = vmov 0.0   ;;  %v76_v1 = vld [vmem:[#allocation8 + $0x8] sm:$0xff]  ;;  %v79_v2 = vld [vmem:[#allocation8 + $0x20] sm:$0xff]  ;;  %p660_p10 = scmp.le.s32.totalorder %s1226_s0, 0 }
  0x38   :  { %204 = vmatprep.mubr.f32.mxu0 %v1047_v0  ;;  %382 = vst [vmem:[#allocation11] sm:$0xff] %v1047_v0  ;;  %v75_v3 = vld [vmem:[#allocation8] sm:$0xff]  ;;  %v786_v4 = vpack.c.bf16 %v79_v2, %v76_v1  ;;  %v78_v5 = vld [vmem:[#allocation8 + $0x18] sm:$0xff]  ;;  %v85_v7 = vld [vmem:[#allocation8 + $0x50] sm:$0xff]  ;;  %s1181_s18 = smov (!%p660_p10), 0  }
  0x39   :  { %v82_v6 = vld [vmem:[#allocation8 + $0x38] sm:$0xff]  ;;  %v788_v8 = vpack.c.bf16 %v78_v5, %v75_v3  ;;  %v81_v10 = vld [vmem:[#allocation8 + $0x30] sm:$0xff]  ;;  %v84_v11 = vld [vmem:[#allocation8 + $0x48] sm:$0xff] }
  0x3a   :  { %v790_v9 = vpack.c.bf16 %v85_v7, %v82_v6  ;;  %v88_v12 = vld [vmem:[#allocation8 + $0x68] sm:$0xff]  ;;  %787 = vmatprep.subr.bf16.mxu0 %v786_v4  ;;  %v91_v13 = vld [vmem:[#allocation8 + $0x80] sm:$0xff]  ;;  %v792_v14 = vpack.c.bf16 %v84_v11, %v81_v10  ;;  %v90_v17 = vld [vmem:[#allocation8 + $0x78] sm:$0xff] }
  0x3b   :  { %789 = vmatpush1.bf16.msra.mxu0 %v788_v8  ;;  %v87_v15 = vld [vmem:[#allocation8 + $0x60] sm:$0xff]  ;;  %v794_v16 = vpack.c.bf16 %v91_v13, %v88_v12  ;;  %v77_v18 = vld [vmem:[#allocation8 + $0x10] sm:$0xff]  ;;  %v80_v19 = vld [vmem:[#allocation8 + $0x28] sm:$0xff] }
  0x3c   :  { %791 = vmatprep.subr.bf16.mxu0 %v790_v9  ;;  %v94_v20 = vld [vmem:[#allocation8 + $0x98] sm:$0xff]  ;;  %v97_v21 = vld [vmem:[#allocation8 + $0xb0] sm:$0xff]  ;;  %v818_v22 = vpack.c.bf16 %v80_v19, %v77_v18  ;;  %v83_v23 = vld [vmem:[#allocation8 + $0x40] sm:$0xff]  ;;  %v796_v25 = vpack.c.bf16 %v90_v17, %v87_v15  ;;  %v125_v18 = vlaneseq }
  0x3d   :  { %v86_v24 = vld [vmem:[#allocation8 + $0x58] sm:$0xff]  ;;  %v93_v26 = vld [vmem:[#allocation8 + $0x90] sm:$0xff]  ;;  %v798_v28 = vpack.c.bf16 %v97_v21, %v94_v20  ;;  %v96_v29 = vld [vmem:[#allocation8 + $0xa8] sm:$0xff] }
  0x3e   :  { %819 = vmatprep.subr.bf16.mxu1 %v818_v22  ;;  %v822_v27 = vpack.c.bf16 %v86_v24, %v83_v23  ;;  %v89_v30 = vld [vmem:[#allocation8 + $0x70] sm:$0xff]  ;;  %v92_v31 = vld [vmem:[#allocation8 + $0x88] sm:$0xff]  ;;  %v103_v33 = vld [vmem:[#allocation8 + $0xe0] sm:$0xff]  ;;  %v800_v37 = vpack.c.bf16 %v96_v29, %v93_v26  ;;  %v1144_v19 = vshrl.u32 %v125_v18, 7 }
  0x3f   :  { %793 = vmatpush1.bf16.msra.mxu0 %v792_v14  ;;  %821 = vmatpush3.bf16.msra.mxu1 %v818_v22  ;;  %v100_v32 = vld [vmem:[#allocation8 + $0xc8] sm:$0xff]  ;;  %v826_v34 = vpack.c.bf16 %v92_v31, %v89_v30  ;;  %v95_v35 = vld [vmem:[#allocation8 + $0xa0] sm:$0xff]  ;;  %v98_v36 = vld [vmem:[#allocation8 + $0xb8] sm:$0xff] }
  0x40   :  { %795 = vmatprep.subr.bf16.mxu0 %v794_v16  ;;  %823 = vmatprep.subr.bf16.mxu1 %v822_v27  ;;  %v802_v38 = vpack.c.bf16 %v103_v33, %v100_v32  ;;  %v99_v39 = vld [vmem:[#allocation8 + $0xc0] sm:$0xff]  ;;  %v102_v40 = vld [vmem:[#allocation8 + $0xd8] sm:$0xff]  ;;  %v109_v42 = vld [vmem:[#allocation8 + $0x110] sm:$0xff]  ;;  %v830_v43 = vpack.c.bf16 %v98_v36, %v95_v35  ;;  %v127_v20 = vsub.s32 0, %v1144_v19  ;;  %v131_v22 = vsub.s32 1, %v1144_v19 }
  0x41   :  { %v106_v41 = vld [vmem:[#allocation8 + $0xf8] sm:$0xff]  ;;  %v67_v44 = vld [vmem:[#allocation5] sm:$0xff]  ;;  %v101_v45 = vld [vmem:[#allocation8 + $0xd0] sm:$0xff]  ;;  %v804_v47 = vpack.c.bf16 %v102_v40, %v99_v39 }
  0x42   :  { %v104_v46 = vld [vmem:[#allocation8 + $0xe8] sm:$0xff]  ;;  %739 = vmatprep.mubr.f32.mxu1 %v67_v44  ;;  %v806_v48 = vpack.c.bf16 %v109_v42, %v106_v41  ;;  %v105_v49 = vld [vmem:[#allocation8 + $0xf0] sm:$0xff]  ;;  %v115_v52 = vld [vmem:[#allocation8 + $0x140] sm:$0xff] }
  0x43   :  { %797 = vmatpush1.bf16.msra.mxu0 %v796_v25  ;;  %825 = vmatpush3.bf16.msra.mxu1 %v822_v27  ;;  %v108_v50 = vld [vmem:[#allocation8 + $0x108] sm:$0xff]  ;;  %v834_v53 = vpack.c.bf16 %v104_v46, %v101_v45  ;;  %v107_v54 = vld [vmem:[#allocation8 + $0x100] sm:$0xff]  ;;  %v110_v55 = vld [vmem:[#allocation8 + $0x118] sm:$0xff] }
  0x44   :  { %799 = vmatprep.subr.bf16.mxu0 %v798_v28  ;;  %827 = vmatprep.subr.bf16.mxu1 %v826_v34  ;;  %v112_v51 = vld [vmem:[#allocation8 + $0x128] sm:$0xff]  ;;  %v808_v56 = vpack.c.bf16 %v108_v50, %v105_v49  ;;  %v111_v58 = vld [vmem:[#allocation8 + $0x120] sm:$0xff]  ;;  %v114_v59 = vld [vmem:[#allocation8 + $0x138] sm:$0xff]  ;;  %v838_v62 = vpack.c.bf16 %v110_v55, %v107_v54 }
  0x45   :  { %v810_v57 = vpack.c.bf16 %v115_v52, %v112_v51  ;;  %v118_v60 = vld [vmem:[#allocation8 + $0x158] sm:$0xff]  ;;  %v121_v61 = vld [vmem:[#allocation8 + $0x170] sm:$0xff]  ;;  %v116_v1 = vld [vmem:[#allocation8 + $0x148] sm:$0xff]  ;;  %v812_v2 = vpack.c.bf16 %v114_v59, %v111_v58 }
  0x46   :  { %v113_v63 = vld [vmem:[#allocation8 + $0x130] sm:$0xff]  ;;  %v814_v3 = vpack.c.bf16 %v121_v61, %v118_v60  ;;  %v120_v5 = vld [vmem:[#allocation8 + $0x168] sm:$0xff]  ;;  %v119_v7 = vld [vmem:[#allocation8 + $0x160] sm:$0xff] }
  0x47   :  { %801 = vmatpush1.bf16.msra.mxu0 %v800_v37  ;;  %829 = vmatpush3.bf16.msra.mxu1 %v826_v34  ;;  %v117_v4 = vld [vmem:[#allocation8 + $0x150] sm:$0xff]  ;;  %v842_v6 = vpack.c.bf16 %v116_v1, %v113_v63  ;;  %v122_v8 = vld [vmem:[#allocation8 + $0x178] sm:$0xff]  ;;  %v68_v11 = vld [vmem:[#allocation5 + $0x8] sm:$0xff] }
  0x48   :  { %803 = vmatprep.subr.bf16.mxu0 %v802_v38  ;;  %831 = vmatprep.subr.bf16.mxu1 %v830_v43  ;;  %v816_v9 = vpack.c.bf16 %v120_v5, %v117_v4  ;;  %v846_v10 = vpack.c.bf16 %v122_v8, %v119_v7  ;;  %v69_v12 = vld [vmem:[#allocation5 + $0x10] sm:$0xff]  ;;  %v70_v13 = vld [vmem:[#allocation5 + $0x18] sm:$0xff]  ;;  %v71_v14 = vld [vmem:[#allocation5 + $0x20] sm:$0xff] }
  0x49   :  { %v72_v15 = vld [vmem:[#allocation5 + $0x28] sm:$0xff]  ;;  %v73_v16 = vld [vmem:[#allocation5 + $0x30] sm:$0xff]  ;;  %v74_v17 = vld [vmem:[#allocation5 + $0x38] sm:$0xff] }
  0x4a   :  { %v123_v21 = vld [vmem:[%s1231_s5] sm:$0x7] }
  0x4b   :  { %805 = vmatpush1.bf16.msra.mxu0 %v804_v47  ;;  %833 = vmatpush3.bf16.msra.mxu1 %v830_v43  ;;  %v1153_v23 = vrot.slane %v123_v21, %v127_v20  ;;  %v1157_v24 = vrot.slane %v123_v21, %v131_v22 }
  0x4c   :  { %807 = vmatprep.subr.bf16.mxu0 %v806_v48  ;;  %835 = vmatprep.subr.bf16.mxu1 %v834_v53 }
  0x4f   :  { %809 = vmatpush1.bf16.msra.mxu0 %v808_v56  ;;  %837 = vmatpush3.bf16.msra.mxu1 %v834_v53 }
  0x50   :  { %811 = vmatprep.subr.bf16.mxu0 %v810_v57  ;;  %839 = vmatprep.subr.bf16.mxu1 %v838_v62 }
  0x53   :  { %813 = vmatpush1.bf16.msra.mxu0 %v812_v2  ;;  %841 = vmatpush3.bf16.msra.mxu1 %v838_v62 }
  0x54   :  { %815 = vmatprep.subr.bf16.mxu0 %v814_v3  ;;  %843 = vmatprep.subr.bf16.mxu1 %v842_v6 }
  0x57   :  { %817 = vmatpush1.bf16.msra.mxu0 %v816_v9  ;;  %845 = vmatpush3.bf16.msra.mxu1 %v842_v6 }
  0x58   :  { %847 = vmatprep.subr.bf16.mxu1 %v846_v10 }
  0x5a   :  { %205 = vmatmul.mubr.f32.vlgmr.msra.gmra.mrb[0].mxu0 %v67_v44 }
  0x5b   :  { %210 = vmatprep.mubr.f32.mxu0 %v1047_v0  ;;  %849 = vmatpush3.bf16.msra.mxu1 %v846_v10 }
  0x5e   :  { %211 = vmatmul.mubr.f32.gmra.mrb[2].mxu0 %v68_v11  ;;  %740 = vmatmul.mubr.f32.vlgmr.msra.gmra.mrb[0].mxu1 %v68_v11 }
  0x5f   :  { %216 = vmatprep.mubr.f32.mxu0 %v1047_v0  ;;  %742 = vmatprep.mubr.f32.mxu1 %v69_v12 }
  0x62   :  { %217 = vmatmul.mubr.f32.gmra.mrb[4].mxu0 %v69_v12  ;;  %743 = vmatmul.mubr.f32.gmra.mrb[2].mxu1 %v70_v13 }
  0x63   :  { %222 = vmatprep.mubr.f32.mxu0 %v1047_v0  ;;  %745 = vmatprep.mubr.f32.mxu1 %v71_v14 }
  0x66   :  { %223 = vmatmul.mubr.f32.gmra.mrb[6].mxu0 %v70_v13  ;;  %746 = vmatmul.mubr.f32.gmra.mrb[4].mxu1 %v72_v15 }
  0x67   :  { %228 = vmatprep.mubr.f32.mxu0 %v1047_v0  ;;  %748 = vmatprep.mubr.f32.mxu1 %v73_v16 }
  0x6a   :  { %229 = vmatmul.mubr.f32.gmra.mrb[8].mxu0 %v71_v14  ;;  %749 = vmatmul.mubr.f32.gmra.mrb[6].mxu1 %v74_v17 }
  0x6b   :  { %234 = vmatprep.mubr.f32.mxu0 %v1047_v0 }
  0x6e   :  { %235 = vmatmul.mubr.f32.gmra.mrb[10].mxu0 %v72_v15 }
  0x6f   :  { %240 = vmatprep.mubr.f32.mxu0 %v1047_v0 }
  0x72   :  { %241 = vmatmul.mubr.f32.gmra.mrb[12].mxu0 %v73_v16 }
  0x73   :  { %246 = vmatprep.mubr.f32.mxu0 %v1047_v0  ;;  %v135_v0 = vsub.s32 2, %v1144_v19 }
  0x75   :  { %v136_v29 = vrot.slane %v123_v21, %v135_v0 }
  0x76   :  { %247 = vmatmul.mubr.f32.gmra.mrb[14].mxu0 %v74_v17 }
 0x12d   :  { %v206_v25 = vpop.f32.mrb[0].mxu0 }
 0x12e   :  { %v207_v26 = vadd.f32 %v206_v25, %v1153_v23  ;;  %v208_v27 = vpop.f32.mrb[1].mxu0 }
 0x12f   :  { %v209_v28 = vadd.f32 %v208_v27, %v1157_v24 }
 0x130   :  { %358 = vst [vmem:[#allocation2] sm:$0xff] %v207_v26 }
 0x131   :  { %359 = vst [vmem:[#allocation2 + $0x8] sm:$0xff] %v209_v28  ;;  %v212_v30 = vpop.f32.mrb[2].mxu0  ;;  %v741_v33 = vpop.f32.mrb[0].mxu1 }
 0x132   :  { %v213_v31 = vadd.f32 %v212_v30, %v1153_v23  ;;  %v214_v32 = vpop.f32.mrb[3].mxu0  ;;  %v325_v35 = vadd.f32 %v741_v33, %v136_v29  ;;  %v319_v36 = vpop.f32.mrb[1].mxu1 }
 0x133   :  { %v215_v34 = vadd.f32 %v214_v32, %v1157_v24  ;;  %v320_v37 = vadd.f32 %v319_v36, %v136_v29 }
 0x134   :  { %361 = vst [vmem:[#allocation2 + $0x18] sm:$0xff] %v213_v31  ;;  %363 = vst [vmem:[#allocation2 + $0x28] sm:$0xff] %v325_v35 }
 0x135   :  { %362 = vst [vmem:[#allocation2 + $0x20] sm:$0xff] %v215_v34  ;;  %v218_v38 = vpop.f32.mrb[4].mxu0  ;;  %360 = vst [vmem:[#allocation2 + $0x10] sm:$0xff] %v320_v37  ;;  %v744_v41 = vpop.f32.mrb[2].mxu1 }
 0x136   :  { %v219_v39 = vadd.f32 %v218_v38, %v1153_v23  ;;  %v220_v40 = vpop.f32.mrb[5].mxu0  ;;  %v335_v43 = vadd.f32 %v744_v41, %v136_v29  ;;  %v329_v44 = vpop.f32.mrb[3].mxu1 }
 0x137   :  { %v221_v42 = vadd.f32 %v220_v40, %v1157_v24  ;;  %v330_v45 = vadd.f32 %v329_v44, %v136_v29 }
 0x138   :  { %364 = vst [vmem:[#allocation2 + $0x30] sm:$0xff] %v219_v39  ;;  %369 = vst [vmem:[#allocation2 + $0x58] sm:$0xff] %v335_v43 }
 0x139   :  { %365 = vst [vmem:[#allocation2 + $0x38] sm:$0xff] %v221_v42  ;;  %v224_v46 = vpop.f32.mrb[6].mxu0  ;;  %366 = vst [vmem:[#allocation2 + $0x40] sm:$0xff] %v330_v45  ;;  %v747_v49 = vpop.f32.mrb[4].mxu1 }
 0x13a   :  { %v225_v47 = vadd.f32 %v224_v46, %v1153_v23  ;;  %v226_v48 = vpop.f32.mrb[7].mxu0  ;;  %v345_v51 = vadd.f32 %v747_v49, %v136_v29  ;;  %v339_v52 = vpop.f32.mrb[5].mxu1 }
 0x13b   :  { %v227_v50 = vadd.f32 %v226_v48, %v1157_v24  ;;  %v340_v53 = vadd.f32 %v339_v52, %v136_v29 }
 0x13c   :  { %367 = vst [vmem:[#allocation2 + $0x48] sm:$0xff] %v225_v47  ;;  %375 = vst [vmem:[#allocation2 + $0x88] sm:$0xff] %v345_v51 }
 0x13d   :  { %368 = vst [vmem:[#allocation2 + $0x50] sm:$0xff] %v227_v50  ;;  %v230_v54 = vpop.f32.mrb[8].mxu0  ;;  %372 = vst [vmem:[#allocation2 + $0x70] sm:$0xff] %v340_v53  ;;  %v750_v57 = vpop.f32.mrb[6].mxu1 }
 0x13e   :  { %v231_v55 = vadd.f32 %v230_v54, %v1153_v23  ;;  %v232_v56 = vpop.f32.mrb[9].mxu0  ;;  %v355_v59 = vadd.f32 %v750_v57, %v136_v29  ;;  %v349_v60 = vpop.f32.mrb[7].mxu1 }
 0x13f   :  { %v233_v58 = vadd.f32 %v232_v56, %v1157_v24  ;;  %v350_v61 = vadd.f32 %v349_v60, %v136_v29 }
 0x140   :  { %370 = vst [vmem:[#allocation2 + $0x60] sm:$0xff] %v231_v55  ;;  %381 = vst [vmem:[#allocation2 + $0xb8] sm:$0xff] %v355_v59 }
 0x141   :  { %371 = vst [vmem:[#allocation2 + $0x68] sm:$0xff] %v233_v58  ;;  %v236_v62 = vpop.f32.mrb[10].mxu0  ;;  %378 = vst [vmem:[#allocation2 + $0xa0] sm:$0xff] %v350_v61 }
 0x142   :  { %v237_v63 = vadd.f32 %v236_v62, %v1153_v23  ;;  %v238_v1 = vpop.f32.mrb[11].mxu0 }
 0x143   :  { %v239_v2 = vadd.f32 %v238_v1, %v1157_v24 }
 0x144   :  { %373 = vst [vmem:[#allocation2 + $0x78] sm:$0xff] %v237_v63 }
 0x145   :  { %374 = vst [vmem:[#allocation2 + $0x80] sm:$0xff] %v239_v2  ;;  %v242_v3 = vpop.f32.mrb[12].mxu0 }
 0x146   :  { %v243_v4 = vadd.f32 %v242_v3, %v1153_v23  ;;  %v244_v5 = vpop.f32.mrb[13].mxu0 }
 0x147   :  { %v245_v6 = vadd.f32 %v244_v5, %v1157_v24  ;;  %657 = sbr.rel (%p660_p10) target bundleno = 632 (0x278), region = 58 }
 0x148   :  { %376 = vst [vmem:[#allocation2 + $0x90] sm:$0xff] %v243_v4 }
 0x149   :  { %377 = vst [vmem:[#allocation2 + $0x98] sm:$0xff] %v245_v6  ;;  %v248_v7 = vpop.f32.mrb[14].mxu0 }
 0x14a   :  { %v249_v8 = vadd.f32 %v248_v7, %v1153_v23  ;;  %v250_v9 = vpop.f32.mrb[15].mxu0 }
 0x14b   :  { %v251_v10 = vadd.f32 %v250_v9, %v1157_v24 }
 0x14c   :  { %379 = vst [vmem:[#allocation2 + $0xa8] sm:$0xff] %v249_v8 }
 0x14d   :  { %380 = vst [vmem:[#allocation2 + $0xb0] sm:$0xff] %v251_v10 }
 0x14e LB: > { %v401_v11 = vld [vmem:[#allocation10 + $0x8] sm:$0xff]  ;;  %v404_v12 = vld [vmem:[#allocation10 + $0x20] sm:$0xff]  ;;  %v403_v15 = vld [vmem:[#allocation10 + $0x18] sm:$0xff]  ;;  %v1048_v18 = vmov 0.0|0.0   ;;  %v1049_v21 = vmov 0.0   ;;  %vm1050_vm0 = vmmov 0   ;;  %v628_v56 = vstv %s1038_s18  ;;  %s1038_s18 = sphi %s1181_s18, %s387_s18  }
 0x14f   : > { %v400_v13 = vld [vmem:[#allocation10] sm:$0xff]  ;;  %v850_v14 = vpack.c.bf16 %v404_v12, %v401_v11  ;;  %v407_v16 = vld [vmem:[#allocation10 + $0x38] sm:$0xff]  ;;  %v410_v17 = vld [vmem:[#allocation10 + $0x50] sm:$0xff]  ;;  %882 = vmatprep.subr.bf16.mxu1 %v1048_v18  ;;  %529 = vmatprep.mubr.f32.mxu0 %v1049_v21  ;;  %v1051_v28 = vmov 0   ;;  %s661_s21 = sshll.u32 %s1038_s18, 3  ;;  %s387_s18 = sadd.s32 1, %s1038_s18  }
 0x150   : > { %v852_v23 = vpack.c.bf16 %v403_v15, %v400_v13  ;;  %v854_v24 = vpack.c.bf16 %v410_v17, %v407_v16  ;;  %v406_v25 = vld [vmem:[#allocation10 + $0x30] sm:$0xff]  ;;  %v409_v26 = vld [vmem:[#allocation10 + $0x48] sm:$0xff]  ;;  %783 = vmatprep.mubr.msk.f32.mxu1 %vm1050_vm0, %v1049_v21  ;;  %927 = vset.pattern.permute.xlu0 %v1051_v28  ;;  %v416_v29 = vld [vmem:[#allocation10 + $0x80] sm:$0xff]  ;;  %s392_s22 = sshra.s32 %s661_s21, 3  ;;  %p386_p11 = scmp.ge.s32.totalorder %s387_s18, %s1226_s0 }
 0x151   : > { %v413_v27 = vld [vmem:[#allocation10 + $0x68] sm:$0xff]  ;;  %851 = vmatprep.subr.bf16.mxu0 %v850_v14  ;;  %v856_v30 = vpack.c.bf16 %v409_v26, %v406_v25  ;;  %v412_v32 = vld [vmem:[#allocation10 + $0x60] sm:$0xff]  ;;  %v415_v33 = vld [vmem:[#allocation10 + $0x78] sm:$0xff]  ;;  %s665_s23 = smul.u32 24, %s392_s22 }
 0x152   : > { %853 = vmatpush1.bf16.msra.mxu0 %v852_v23  ;;  %v858_v31 = vpack.c.bf16 %v416_v29, %v413_v27  ;;  %v419_v34 = vld [vmem:[#allocation10 + $0x98] sm:$0xff]  ;;  %v422_v35 = vld [vmem:[#allocation10 + $0xb0] sm:$0xff]  ;;  %v860_v36 = vpack.c.bf16 %v415_v33, %v412_v32  ;;  %v421_v39 = vld [vmem:[#allocation10 + $0xa8] sm:$0xff] }
 0x153   : > { %855 = vmatprep.subr.bf16.mxu0 %v854_v24  ;;  %v862_v37 = vpack.c.bf16 %v422_v35, %v419_v34  ;;  %v418_v38 = vld [vmem:[#allocation10 + $0x90] sm:$0xff]  ;;  %v425_v40 = vld [vmem:[#allocation10 + $0xc8] sm:$0xff]  ;;  %v428_v41 = vld [vmem:[#allocation10 + $0xe0] sm:$0xff]  ;;  %s396_s25 = scalar_lea.vmem [#allocation2], %s665_s23 }
 0x154   : > { %v402_v42 = vld [vmem:[#allocation10 + $0x10] sm:$0xff]  ;;  %v405_v43 = vld [vmem:[#allocation10 + $0x28] sm:$0xff]  ;;  %v408_v45 = vld [vmem:[#allocation10 + $0x40] sm:$0xff]  ;;  %v864_v46 = vpack.c.bf16 %v421_v39, %v418_v38  ;;  %v866_v48 = vpack.c.bf16 %v428_v41, %v425_v40 }
 0x155   : > { %v883_v44 = vpack.c.bf16 %v405_v43, %v402_v42  ;;  %v411_v47 = vld [vmem:[#allocation10 + $0x58] sm:$0xff]  ;;  %v424_v49 = vld [vmem:[#allocation10 + $0xc0] sm:$0xff]  ;;  %v434_v53 = vld [vmem:[#allocation10 + $0x110] sm:$0xff] }
 0x156   : > { %857 = vmatpush1.bf16.msra.mxu0 %v856_v30  ;;  %v427_v50 = vld [vmem:[#allocation10 + $0xd8] sm:$0xff]  ;;  %v886_v52 = vpack.c.bf16 %v411_v47, %v408_v45  ;;  %v414_v54 = vld [vmem:[#allocation10 + $0x70] sm:$0xff]  ;;  %v417_v55 = vld [vmem:[#allocation10 + $0x88] sm:$0xff] }
 0x157   : > { %859 = vmatprep.subr.bf16.mxu0 %v858_v31  ;;  %v431_v51 = vld [vmem:[#allocation10 + $0xf8] sm:$0xff]  ;;  %884 = vmatpush3.bf16.msra.mxu1 %v883_v44  ;;  %v868_v57 = vpack.c.bf16 %v427_v50, %v424_v49  ;;  %v627_v58 = vld [vmem:[%s1228_s2] sm:$0xff]  ;;  %v430_v60 = vld [vmem:[#allocation10 + $0xf0] sm:$0xff]  ;;  %v889_v63 = vpack.c.bf16 %v417_v55, %v414_v54 }
 0x158   : > { %885 = vmatprep.subr.bf16.mxu1 %v1048_v18  ;;  %v870_v59 = vpack.c.bf16 %v434_v53, %v431_v51  ;;  %v433_v61 = vld [vmem:[#allocation10 + $0x108] sm:$0xff]  ;;  %vm629_vm1 = vcmp.gt.s32.totalorder %v627_v58, %v628_v56  ;;  %v440_v1 = vld [vmem:[#allocation10 + $0x140] sm:$0xff]  ;;  %v423_v3 = vld [vmem:[#allocation10 + $0xb8] sm:$0xff] }
 0x159   : > { %v437_v62 = vld [vmem:[#allocation10 + $0x128] sm:$0xff]  ;;  %v420_v2 = vld [vmem:[#allocation10 + $0xa0] sm:$0xff]  ;;  %v630_v4 = vsel %vm629_vm1, 1, %v1051_v28  ;;  %v872_v5 = vpack.c.bf16 %v433_v61, %v430_v60  ;;  %v439_v8 = vld [vmem:[#allocation10 + $0x138] sm:$0xff] }
 0x15a   : > { %861 = vmatpush1.bf16.msra.mxu0 %v860_v36  ;;  %632 = vperm.xlu0 %927, %v630_v4   ;;  %v874_v6 = vpack.c.bf16 %v440_v1, %v437_v62  ;;  %v436_v7 = vld [vmem:[#allocation10 + $0x120] sm:$0xff]  ;;  %v443_v9 = vld [vmem:[#allocation10 + $0x158] sm:$0xff]  ;;  %v892_v10 = vpack.c.bf16 %v423_v3, %v420_v2  ;;  %v446_v11 = vld [vmem:[#allocation10 + $0x170] sm:$0xff] }
 0x15b   : > { %863 = vmatprep.subr.bf16.mxu0 %v862_v37  ;;  %887 = vmatpush3.bf16.msra.mxu1 %v886_v52  ;;  %v426_v12 = vld [vmem:[#allocation10 + $0xd0] sm:$0xff]  ;;  %v429_v13 = vld [vmem:[#allocation10 + $0xe8] sm:$0xff]  ;;  %v876_v14 = vpack.c.bf16 %v439_v8, %v436_v7  ;;  %v878_v15 = vpack.c.bf16 %v446_v11, %v443_v9  ;;  %v432_v23 = vld [vmem:[#allocation10 + $0x100] sm:$0xff] }
 0x15c   : > { %888 = vmatprep.subr.bf16.mxu1 %v1048_v18  ;;  %v442_v16 = vld [vmem:[#allocation10 + $0x150] sm:$0xff]  ;;  %v445_v17 = vld [vmem:[#allocation10 + $0x168] sm:$0xff]  ;;  %v895_v21 = vpack.c.bf16 %v429_v13, %v426_v12  ;;  %v435_v24 = vld [vmem:[#allocation10 + $0x118] sm:$0xff] }
 0x15d   : > { %v880_v25 = vpack.c.bf16 %v445_v17, %v442_v16  ;;  %v898_v26 = vpack.c.bf16 %v435_v24, %v432_v23  ;;  %v438_v27 = vld [vmem:[#allocation10 + $0x130] sm:$0xff]  ;;  %v441_v28 = vld [vmem:[#allocation10 + $0x148] sm:$0xff]  ;;  %v390_v29 = vld [vmem:[#allocation11] sm:$0xff] }
 0x15e   : > { %865 = vmatpush1.bf16.msra.mxu0 %v864_v46  ;;  %v901_v30 = vpack.c.bf16 %v441_v28, %v438_v27  ;;  %v444_v31 = vld [vmem:[#allocation10 + $0x160] sm:$0xff]  ;;  %v447_v32 = vld [vmem:[#allocation10 + $0x178] sm:$0xff]  ;;  %v399_v55 = vld [vmem:[%s396_s25 + $0x10] sm:$0xff] }
 0x15f   : > { %867 = vmatprep.subr.bf16.mxu0 %v866_v48  ;;  %890 = vmatpush3.bf16.msra.mxu1 %v889_v63  ;;  %v904_v33 = vpack.c.bf16 %v447_v32, %v444_v31  ;;  %v448_v34 = vld [vmem:[%s1232_s6] sm:$0x7] }
 0x160   : > { %891 = vmatprep.subr.bf16.mxu1 %v1048_v18  ;;  %v453_v35 = vrot.slane %v448_v34, %v127_v20  ;;  %v457_v36 = vrot.slane %v448_v34, %v131_v22  ;;  %v397_v37 = vld [vmem:[%s396_s25] sm:$0xff]  ;;  %v461_v50 = vrot.slane %v448_v34, %v135_v0 }
 0x162   : > { %869 = vmatpush1.bf16.msra.mxu0 %v868_v57 }
 0x163   : > { %871 = vmatprep.subr.bf16.mxu0 %v870_v59  ;;  %893 = vmatpush3.bf16.msra.mxu1 %v892_v10 }
 0x164   : > { %894 = vmatprep.subr.bf16.mxu1 %v1048_v18 }
 0x166   : > { %873 = vmatpush1.bf16.msra.mxu0 %v872_v5 }
 0x167   : > { %875 = vmatprep.subr.bf16.mxu0 %v874_v6  ;;  %896 = vmatpush3.bf16.msra.mxu1 %v895_v21 }
 0x168   : > { %897 = vmatprep.subr.bf16.mxu1 %v1048_v18 }
 0x16a   : > { %877 = vmatpush1.bf16.msra.mxu0 %v876_v14 }
 0x16b   : > { %879 = vmatprep.subr.bf16.mxu0 %v878_v15  ;;  %899 = vmatpush3.bf16.msra.mxu1 %v898_v26 }
 0x16c   : > { %900 = vmatprep.subr.bf16.mxu1 %v1048_v18 }
 0x16e   : > { %881 = vmatpush1.bf16.msra.mxu0 %v880_v25 }
 0x16f   : > { %902 = vmatpush3.bf16.msra.mxu1 %v901_v30 }
 0x170   : > { %903 = vmatprep.subr.bf16.mxu1 %v1048_v18  ;;  %v398_v18 = vld [vmem:[%s396_s25 + $0x8] sm:$0xff] }
 0x171   : > { %530 = vmatmul.mubr.f32.vlgmr.msra.gmra.mrb[0].mxu0 %v390_v29 }
 0x173   : > { %905 = vmatpush3.bf16.msra.mxu1 %v904_v33 }
 0x176   : > { %784 = vmatmul.mubr.f32.vlgmr.msra.gmra.mrb[0].mxu1 %v390_v29 }
 0x1d9   : > { %v633_v59 = vpop.permute.xlu0 %632 }
 0x1da   : > { %vm634_vm2 = vcmp.eq.s32.totalorder %v633_v59, 1 }
 0x244   : > { %v531_v38 = vpop.f32.mrb[0].mxu0 }
 0x245   : > { %v532_v39 = vadd.f32 %v531_v38, %v453_v35  ;;  %v533_v40 = vpop.f32.mrb[1].mxu0 }
 0x246   : > { %v534_v41 = vadd.f32 %v533_v40, %v457_v36 }
 0x247   : > { %v606_v42 = vadd.f32 %v532_v39, %v397_v37 }
 0x248   : > { %v613_v43 = vadd.f32 %v534_v41, %v398_v18 }
 0x249   : > { %v663_v44 = vmul.f32 -1.442695, %v606_v42  ;;  %v602_v45 = vpop.f32.mrb[0].mxu1 }
 0x24a   : > { %v664_v46 = vmul.f32 -1.442695, %v613_v43  ;;  %v785_v47 = vpop.f32.mrb[1].mxu1  ;;  %v603_v53 = vadd.f32 %v602_v45, %v461_v50 }
 0x24b   : > { %928 = vpow2.f32 %v663_v44 }
 0x24c   : > { %930 = vpow2.f32 %v664_v46 }
 0x255   : > { %v929_v48 = vpop.eup %928 }
 0x256   : > { %v610_v49 = vadd.f32 1.0, %v929_v48  ;;  %v931_v51 = vpop.eup %930 }
 0x257   : > { %v617_v52 = vadd.f32 1.0, %v931_v51 }
 0x258   : > { %932 = vrcp.f32 %v610_v49 }
 0x259   : > { %934 = vrcp.f32 %v617_v52 }
 0x262   : > { %v933_v54 = vpop.eup %932 }
 0x263   : > { %v620_v56 = vmul.f32 %v933_v54, %v603_v53  ;;  %v935_v58 = vpop.eup %934 }
 0x264   : > { %v623_v60 = vsub.f32 1.0, %v935_v58  ;;  %v625_v63 = vmul.f32 %v935_v58, %v390_v29 }
 0x265   : > { %v621_v57 = vadd.f32 %v620_v56, %v399_v55 }
 0x267   : > { %936 = vtanh.f32 %v621_v57 }
 0x271   : > { %v937_v61 = vpop.eup %936  ;;  %389 = sbr.rel (!%p386_p11) target bundleno = 334 (0x14e), region = 64 }
 0x272   : > { %v624_v62 = vmul.f32 %v937_v61, %v623_v60 }
 0x274   : > { %v626_v1 = vadd.f32 %v625_v63, %v624_v62 }
 0x276   : > { %v635_v2 = vsel %vm634_vm2, %v626_v1, %v390_v29 }
 0x277   : > { %636 = vst [vmem:[#allocation11] sm:$0xff] %v635_v2 }
 0x278 PF:  { %s1052_s28 = smov [#allocation11]  }
 0x279   :  { %s643_s29 = sshll.u32 %s1052_s28, 4  ;;  %s644_s29 = int_to_ptr.vmem [resolvable:$true] %s643_s29 }
 0x27a   :  { %s1004_s30 = scalar_lea.vmem %s644_s29, 128  ;;  %p1009_p13 = scmp.lt.s32.totalorder %s644_s29, %s644_s29 }
 0x27b   :  { %p1005_p12 = scmp.ne.s32.totalorder %s644_s29, %s1004_s30  ;;  %p1010_p0 = scmp.lt.s32.totalorder %s1004_s30, %s1004_s30 }
 0x27d   :  { %p1011_p1 = por %p1010_p0, %p1009_p13 }
 0x27f   :  { %p1012_p2 = pnand %p1011_p1, %p1005_p12 }
 0x281   :  { %1015 = shalt.err (!%p1012_p2)
}
 0x282   :  { %s1016_s10 = scalar_lea.hbm %s1233_s7, 128 }
 0x283   :  { %p1017_p3 = scmp.ne.s32.totalorder %s1233_s7, %s1016_s10  ;;  %p1020_p4 = scmp.lt.u32.totalorder %s1016_s10, %s1233_s7 }
 0x285   :  { %p1022_p5 = pnand %p1020_p4, %p1017_p3 }
 0x287   :  { %1025 = shalt.err (!%p1022_p5)
}
 0x288   :  { %646 = dma.vmem_to_hbm [thread:$0]  %s644_s29, 128, %s1233_s7, [#allocation7]  }
 0x289   :  { %1034 = dma.done.wait [#allocation7], 128  }
 0x28a   :  { %1035 = vsyncadd [#allocation7], 4294967168 }
 0x28b   :  { %650 = vsyncpa [#allocation6], 1 }
 0x28c   :  { %651 = vsyncpa [#allocation9], 1 }
 0x28d   :  { %652 = vsyncpa [#allocation7], 1 }

</bundles_post_ra>
